<compile_context>
chip_gen: v7x
topology: tpu7x:2x2x1
jax: 0.10.0
libtpu: 0.0.40
codegen_flags: <defaults>
</compile_context>

<pallas_src>
import functools

import jax
import jax.numpy as jnp
from jax.experimental import pallas as pl
from jax.experimental.pallas import tpu as pltpu


# --------------------------------------------------------------------------- #
# Kernel
# --------------------------------------------------------------------------- #
def _yolo_kernel(grid_ref, anch_ref, x_ref, o_ref, *, stride, new_coords):
    """Processes B (batch, anchor) slabs x one spatial tile, channel-major.

    grid_ref : (1, 2, ts)  f32      flattened-spatial (gx, gy) for this tile
    anch_ref : (B, 2, 1)   f32      per-slab (anchor_w, anchor_h)
    x_ref    : (B, no, ts) x.dtype  raw predictions (channels on sublanes,
                                    spatial on lanes -> lane-dense)
    o_ref    : (B, no, ts) x.dtype  transformed predictions (same layout)
    """
    g = grid_ref[...]                                  # (1, 2, ts) f32
    a = anch_ref[...].astype(jnp.float32)              # (B, 2, 1)
    xy = x_ref[:, 0:2, :].astype(jnp.float32)          # (B, 2, ts)
    wh = x_ref[:, 2:4, :].astype(jnp.float32)          # (B, 2, ts)

    if new_coords:
        xy = (xy + g) * stride
        wh = (wh * wh) * (4.0 * a)
        rest = x_ref[:, 4:, :]                         # passed through raw
    else:
        xy = (jax.nn.sigmoid(xy) + g) * stride         # sigmoid only on 2 rows
        wh = jnp.exp(wh) * a                           # exp only on 2 rows
        rest = jax.nn.sigmoid(x_ref[:, 4:, :].astype(jnp.float32))

    # Direct sublane row-sliced stores: no concat, no transpose, lane-dense.
    o_ref[:, 0:2, :] = xy.astype(o_ref.dtype)
    o_ref[:, 2:4, :] = wh.astype(o_ref.dtype)
    o_ref[:, 4:, :] = rest.astype(o_ref.dtype)


# --------------------------------------------------------------------------- #
# Tiling / VMEM heuristics (generation-aware)
# --------------------------------------------------------------------------- #
def _round_up(v, m):
    return -(-v // m) * m


def _sublane(itemsize):
    return {4: 8, 2: 16, 1: 32}.get(itemsize, 8)


def _vmem_budget_and_limit():
    """Pick a per-step VMEM working-set budget and an explicit scoped limit."""
    phys = 64 * 1024 * 1024  # conservative fallback (v7x per-core VMEM)
    try:
        info = pltpu.get_tpu_info()
        phys = int(getattr(info, "vmem_capacity_bytes", phys))
    except Exception:
        pass
    # ~1/4 of physical for our double-buffered blocks, capped at 28 MiB
    # (v5e/v6e: 28 MiB of 128 MiB; v7x: 16 MiB of 64 MiB).
    budget = max(min(phys // 4, 28 * 1024 * 1024), 8 * 1024 * 1024)
    limit = min(phys // 2, max(2 * budget, 32 * 1024 * 1024))
    return budget, limit


def _pick_tiles(n_slabs, no, s, itemsize, budget_bytes):
    """Choose (B slabs per step, spatial tile ts) fitting the VMEM budget.

    Accounts for double-buffered x/out blocks *and* the grid-const / anchor
    blocks (lane/sublane padding included).  Prefers >= 4 total grid steps
    (pipelining + v7x 2-TC sharding), then the largest per-step tile.
    """
    sub = _sublane(itemsize)

    def block_bytes(b, ts):
        ts_pad = _round_up(ts, 128)
        x_b = b * _round_up(no, sub) * ts_pad * itemsize
        o_b = x_b
        g_b = 8 * ts_pad * 4            # (1, 2, ts) f32, padded
        a_b = b * 8 * 128 * 4           # (B, 2, 1) f32, padded
        return 2 * (x_b + o_b + g_b + a_b)   # x2 for double buffering

    if s % 128 == 0:
        ts_cands = sorted(
            {t for t in range(128, min(s, 2048) + 1, 128) if s % t == 0},
            reverse=True)
    else:
        ts_cands = []
    if not ts_cands:
        ts_cands = [s]                  # full spatial extent (always legal)

    b_cands = sorted((d for d in range(1, n_slabs + 1) if n_slabs % d == 0),
                     reverse=True)

    best = None
    for ts in ts_cands:
        for b in b_cands:
            if block_bytes(b, ts) > budget_bytes:
                continue
            steps = (n_slabs // b) * (s // ts)
            key = (min(steps, 4), b * ts, ts)
            if best is None or key > best[0]:
                best = (key, b, ts)
    if best is None:
        return 1, ts_cands[-1]
    return best[1], best[2]


# --------------------------------------------------------------------------- #
# Wrapper
# --------------------------------------------------------------------------- #
def yolo_layer_forward(x, anchors, num_classes, img_size, new_coords=False,
                       return_channel_major=False):
    """Inference forward of YOLOLayer.

    x: (bs, na * (num_classes + 5), ny, nx)  (NCHW, like PyTorch; any float dtype)
    anchors: (na, 2)
    returns: (bs, na * ny * nx, num_classes + 5)   [module layout]
             or (bs, na, no, ny, nx) if return_channel_major=True.
    """
    bs, c, ny, nx = x.shape
    na = anchors.shape[0]
    no = num_classes + 5
    assert c == na * no, f"channel mismatch: {c} != {na}*{no}"
    stride = img_size // ny
    s = ny * nx
    n_slabs = bs * na

    # view(bs, na, no, ny, nx) flattened to (bs*na, no, ny*nx): pure reshape,
    # kept in the input's native dtype (cast happens inside the kernel).
    x2 = x.reshape(n_slabs, no, s)

    # Precomputed flattened-spatial (gx, gy) grid, sliced per spatial tile.
    col = jnp.arange(s, dtype=jnp.int32)
    grid2 = jnp.stack(
        [(col % nx).astype(jnp.float32), (col // nx).astype(jnp.float32)],
        axis=0)[None]                                          # (1, 2, s)

    # Per-slab anchor table: slab i = (batch i // na, anchor i % na).
    anch_tbl = jnp.tile(anchors.astype(jnp.float32), (bs, 1)).reshape(n_slabs, 2, 1)

    budget, vmem_limit = _vmem_budget_and_limit()
    B, ts = _pick_tiles(n_slabs, no, s, jnp.dtype(x.dtype).itemsize, budget)

    kernel = functools.partial(
        _yolo_kernel, stride=float(stride), new_coords=new_coords)

    out = pl.pallas_call(
        kernel,
        out_shape=jax.ShapeDtypeStruct((n_slabs, no, s), x.dtype),
        grid=(n_slabs // B, s // ts),
        in_specs=[
            pl.BlockSpec((1, 2, ts), lambda i, j: (0, 0, j)),   # grid consts
            pl.BlockSpec((B, 2, 1), lambda i, j: (i, 0, 0)),    # anchors
            pl.BlockSpec((B, no, ts), lambda i, j: (i, 0, j)),  # predictions
        ],
        out_specs=pl.BlockSpec((B, no, ts), lambda i, j: (i, 0, j)),
        compiler_params=pltpu.CompilerParams(
            dimension_semantics=("parallel", "parallel"),
            vmem_limit_bytes=int(vmem_limit)),
    )(grid2, anch_tbl, x2)

    if return_channel_major:
        # Lane-dense kernel layout; downstream consumers can use it directly.
        return out.reshape(bs, na, no, ny, nx)

    # Module-mandated layout (bs, na*ny*nx, no): one dense XLA transpose.
    out = out.reshape(bs, na, no, s)
    out = jnp.transpose(out, (0, 1, 3, 2))
    return out.reshape(bs, na * s, no)


# --------------------------------------------------------------------------- #
# Pure-JAX reference (mirrors the PyTorch eval path)
# --------------------------------------------------------------------------- #
def yolo_layer_ref(x, anchors, num_classes, img_size, new_coords=False):
    bs, c, ny, nx = x.shape
    na = anchors.shape[0]
    no = num_classes + 5
    stride = img_size // ny
    xr = x.reshape(bs, na, no, ny, nx).transpose(0, 1, 3, 4, 2)
    yv, xv = jnp.meshgrid(jnp.arange(ny), jnp.arange(nx), indexing="ij")
    grid = jnp.stack((xv, yv), 2).reshape(1, 1, ny, nx, 2).astype(jnp.float32)
    anchor_grid = anchors.reshape(1, na, 1, 1, 2).astype(jnp.float32)
    if new_coords:
        xy = (xr[..., 0:2] + grid) * stride
        wh = xr[..., 2:4] ** 2 * (4.0 * anchor_grid)
        rest = xr[..., 4:]
    else:
        xy = (jax.nn.sigmoid(xr[..., 0:2]) + grid) * stride
        wh = jnp.exp(xr[..., 2:4]) * anchor_grid
        rest = jax.nn.sigmoid(xr[..., 4:])
    out = jnp.concatenate([xy, wh, rest], axis=-1)
    return out.reshape(bs, -1, no)


# --------------------------------------------------------------------------- #
# Self-test
# --------------------------------------------------------------------------- #
if __name__ == "__main__":
    # Small, deterministic config consistent with the module:
    # 3 anchors, 3 classes -> no = 8, channels = 3 * 8 = 24.
    anchors_list = [(10, 13), (16, 30), (33, 23)]
    num_classes = 3
    bs, ny, nx = 2, 16, 16
    img_size = 512  # stride = 512 // 16 = 32
    na = len(anchors_list)
    no = num_classes + 5

    key = jax.random.PRNGKey(0)
    x = jax.random.normal(key, (bs, na * no, ny, nx), dtype=jnp.float32)
    anchors = jnp.array(anchors_list, dtype=jnp.float32)  # (na, 2)

    for new_coords in (False, True):
        out = jax.block_until_ready(
            yolo_layer_forward(x, anchors, num_classes, img_size, new_coords))
        ref = jax.block_until_ready(
            yolo_layer_ref(x, anchors, num_classes, img_size, new_coords))
        assert out.shape == (bs, na * ny * nx, no), out.shape
        assert jnp.allclose(out, ref, rtol=1e-5, atol=1e-5), (
            f"new_coords={new_coords}: max abs err {jnp.max(jnp.abs(out - ref))}")

    print("KERNEL_OK")
</pallas_src>

<mosaic_0001>
module attributes {stable_mosaic.version = 11 : i64} {
  func.func @_yolo_kernel(%arg0: i32, %arg1: i32, %arg2: memref<1x2x128xf32, #tpu.memory_space<vmem>>, %arg3: memref<3x2x1xf32, #tpu.memory_space<vmem>>, %arg4: memref<3x8x128xf32, #tpu.memory_space<vmem>>, %arg5: memref<3x8x128xf32, #tpu.memory_space<vmem>>) attributes {dimension_semantics = [#tpu.dimension_semantics<parallel>, #tpu.dimension_semantics<parallel>], iteration_bounds = array<i64: 2, 2>, scalar_prefetch = 0 : i64, scratch_operands = 0 : i64, tpu.core_type = #tpu.core_type<tc>, window_params = [{transform_indices = @transform_0, window_bounds = array<i64: 1, 2, 128>}, {transform_indices = @transform_1, window_bounds = array<i64: 3, 2, 1>}, {transform_indices = @transform_2, window_bounds = array<i64: 3, 8, 128>}, {transform_indices = @transform_3, window_bounds = array<i64: 3, 8, 128>}]} {
    %c0 = arith.constant 0 : index
    %c0_0 = arith.constant 0 : index
    %c0_1 = arith.constant 0 : index
    %0 = vector.load %arg2[%c0, %c0_0, %c0_1] : memref<1x2x128xf32, #tpu.memory_space<vmem>>, vector<1x2x128xf32>
    %c0_2 = arith.constant 0 : index
    %c0_3 = arith.constant 0 : index
    %c0_4 = arith.constant 0 : index
    %1 = vector.load %arg3[%c0_2, %c0_3, %c0_4] : memref<3x2x1xf32, #tpu.memory_space<vmem>>, vector<3x2x1xf32>
    %c0_5 = arith.constant 0 : index
    %c0_6 = arith.constant 0 : index
    %c0_7 = arith.constant 0 : index
    %2 = vector.load %arg4[%c0_5, %c0_6, %c0_7] : memref<3x8x128xf32, #tpu.memory_space<vmem>>, vector<3x2x128xf32>
    %c0_8 = arith.constant 0 : index
    %c2 = arith.constant 2 : index
    %c0_9 = arith.constant 0 : index
    %3 = vector.load %arg4[%c0_8, %c2, %c0_9] : memref<3x8x128xf32, #tpu.memory_space<vmem>>, vector<3x2x128xf32>
    %4 = arith.negf %2 : vector<3x2x128xf32>
    %5 = math.exp %4 : vector<3x2x128xf32>
    %cst = arith.constant 1.000000e+00 : f32
    %6 = vector.broadcast %cst : f32 to vector<3x2x128xf32>
    %7 = arith.addf %6, %5 : vector<3x2x128xf32>
    %8 = arith.divf %6, %7 : vector<3x2x128xf32>
    %9 = vector.broadcast %0 : vector<1x2x128xf32> to vector<3x2x128xf32>
    %10 = arith.addf %8, %9 : vector<3x2x128xf32>
    %cst_10 = arith.constant 3.200000e+01 : f32
    %11 = vector.broadcast %cst_10 : f32 to vector<3x2x128xf32>
    %12 = arith.mulf %10, %11 : vector<3x2x128xf32>
    %13 = math.exp %3 : vector<3x2x128xf32>
    %14 = vector.broadcast %1 : vector<3x2x1xf32> to vector<3x2x128xf32>
    %15 = arith.mulf %13, %14 : vector<3x2x128xf32>
    %c0_11 = arith.constant 0 : index
    %c4 = arith.constant 4 : index
    %c0_12 = arith.constant 0 : index
    %16 = vector.load %arg4[%c0_11, %c4, %c0_12] : memref<3x8x128xf32, #tpu.memory_space<vmem>>, vector<3x4x128xf32>
    %17 = arith.negf %16 : vector<3x4x128xf32>
    %18 = math.exp %17 : vector<3x4x128xf32>
    %cst_13 = arith.constant 1.000000e+00 : f32
    %19 = vector.broadcast %cst_13 : f32 to vector<3x4x128xf32>
    %20 = arith.addf %19, %18 : vector<3x4x128xf32>
    %21 = arith.divf %19, %20 : vector<3x4x128xf32>
    %c0_14 = arith.constant 0 : index
    %c0_15 = arith.constant 0 : index
    %c0_16 = arith.constant 0 : index
    %22 = vector.load %arg5[%c0_14, %c0_15, %c0_16] : memref<3x8x128xf32, #tpu.memory_space<vmem>>, vector<3x2x128xf32>
    tpu.vector_store %arg5[%c0_14, %c0_15, %c0_16], %12 {strides = array<i32>} : memref<3x8x128xf32, #tpu.memory_space<vmem>>, vector<3x2x128xf32>,
    %c0_17 = arith.constant 0 : index
    %c2_18 = arith.constant 2 : index
    %c0_19 = arith.constant 0 : index
    %23 = vector.load %arg5[%c0_17, %c2_18, %c0_19] : memref<3x8x128xf32, #tpu.memory_space<vmem>>, vector<3x2x128xf32>
    tpu.vector_store %arg5[%c0_17, %c2_18, %c0_19], %15 {strides = array<i32>} : memref<3x8x128xf32, #tpu.memory_space<vmem>>, vector<3x2x128xf32>,
    %c0_20 = arith.constant 0 : index
    %c4_21 = arith.constant 4 : index
    %c0_22 = arith.constant 0 : index
    %24 = vector.load %arg5[%c0_20, %c4_21, %c0_22] : memref<3x8x128xf32, #tpu.memory_space<vmem>>, vector<3x4x128xf32>
    tpu.vector_store %arg5[%c0_20, %c4_21, %c0_22], %21 {strides = array<i32>} : memref<3x8x128xf32, #tpu.memory_space<vmem>>, vector<3x4x128xf32>,
    return
  }
  func.func @transform_0(%arg0: i32, %arg1: i32) -> (i32, i32, i32) {
    %c0_i32 = arith.constant 0 : i32
    %c0_i32_0 = arith.constant 0 : i32
    %c0_i32_1 = arith.constant 0 : i32
    return %c0_i32, %c0_i32_0, %arg1 : i32, i32, i32
  }
  func.func @transform_1(%arg0: i32, %arg1: i32) -> (i32, i32, i32) {
    %c0_i32 = arith.constant 0 : i32
    %c0_i32_0 = arith.constant 0 : i32
    %c0_i32_1 = arith.constant 0 : i32
    return %arg0, %c0_i32, %c0_i32_0 : i32, i32, i32
  }
  func.func @transform_2(%arg0: i32, %arg1: i32) -> (i32, i32, i32) {
    %c0_i32 = arith.constant 0 : i32
    %c0_i32_0 = arith.constant 0 : i32
    return %arg0, %c0_i32, %arg1 : i32, i32, i32
  }
  func.func @transform_3(%arg0: i32, %arg1: i32) -> (i32, i32, i32) {
    %c0_i32 = arith.constant 0 : i32
    %c0_i32_0 = arith.constant 0 : i32
    return %arg0, %c0_i32, %arg1 : i32, i32, i32
  }
}

</mosaic_0001>

<bundles_post_ra>
// kernel: tpu_custom_call.1
= control target key start
LH: loop header
LB: loop body
LE: loop exit
PB: predicated region body
PF: predicated region fallthrough
CT: control target
= control target key end

     0   :  { %8 = vsyncpa [#allocation3], 0  ;;  %s994_s0 = inlined_call_operand.vmem [shape: f32[1,2,256], index: 0, kind: input, shape index: {}]   ;;  %s995_s1 = inlined_call_operand.vmem [shape: f32[6,2,1], index: 1, kind: input, shape index: {}]   ;;  %s996_s2 = inlined_call_operand.hbm [shape: f32[6,8,256], index: 2, kind: input, shape index: {}]   ;;  %s997_s3 = inlined_call_operand.hbm [shape: f32[6,8,256], index: 3, kind: output, shape index: {}]  }
   0x1   :  { %10 = vsyncpa [#allocation3 + $0x1], 0 }
   0x2   :  { %11 = vsyncpa [#allocation4], 0 }
   0x3   :  { %13 = vsyncpa [#allocation4 + $0x1], 0  ;;  %s763_s12 = smov 0   ;;  %s765_s13 = smov 0  }
   0x4   :  { %s767_s14 = smov 0   ;;  %s769_s15 = smov 0  }
   0x5   :  { %s771_s16 = smov 0   ;;  %s773_s17 = smov 0  }
   0x6   :  { %s775_s18 = smov 0   ;;  %s777_s19 = smov 0  }
   0x7 LB: > { %s464_s20 = sadd.s32 4294967295, %s732_s19   ;;  %s465_s21 = sadd.s32 4294967294, %s732_s19   ;;  %s732_s19 = sphi %s777_s19, %s19_s19   ;;  %s728_s18 = sphi %s775_s18, %s1012_s18   ;;  %s724_s17 = sphi %s773_s17, %s1011_s17   ;;  %s720_s16 = sphi %s771_s16, %s1010_s16   ;;  %s716_s15 = sphi %s769_s15, %s1009_s15   ;;  %s712_s14 = sphi %s767_s14, %s1008_s14   ;;  %s708_s13 = sphi %s765_s13, %s1007_s13   ;;  %s704_s12 = sphi %s763_s12, %s1006_s12  }
   0x8   : > { %s28_s22 = sadd.s32 1, %s724_s17  ;;  %s31_s23 = sadd.s32 1, %s728_s18 }
   0x9   : > { %p29_p0 = scmp.ge.s32.totalorder %s28_s22, 2  ;;  %s92_s24 = sadd.s32 1, %s712_s14 }
   0xa   : > { %p99_p1 = scmp.ne.s32.totalorder %s712_s14, %s708_s13  ;;  %p100_p2 = scmp.eq.s32.totalorder %s732_s19, 0 }
   0xb   : > { %s1014_s22 = smov (%p29_p0, %s28_s22), 0  ;;  %s1016_s23 = smov (!%p29_p0, %s31_s23), %s728_s18 }
   0xc   : > { %s88_s25 = ssub.s32 %s724_s17, %s1014_s22  ;;  %p816_p3 = por %p100_p2, %p99_p1 }
   0xd   : > { %p33_p4 = scmp.ge.s32.totalorder %s1016_s23, 2  ;;  %p105_p5 = scmp.ne.s32.totalorder %s708_s13, %s704_s12 }
   0xe   : > { %p106_p6 = scmp.eq.s32.totalorder %s464_s20, 0  ;;  %p131_p7 = scmp.eq.s32.totalorder %s464_s20, 3 }
   0xf   : > { %s1018_s23 = smov (%p33_p4, %s1016_s23), 0  ;;  %p137_p10 = scmp.eq.s32.totalorder %s465_s21, 3 }
  0x10   : > { %p824_p8 = por %p106_p6, %p105_p5  ;;  %p828_p9 = por %p131_p7, %p99_p1 }
  0x11   : > { %s87_s29 = ssub.s32 %s728_s18, %s1018_s23  ;;  %p834_p12 = por %p137_p10, %p105_p5 }
  0x12   : > { %s1001_s28 = scalar_select %p828_p9, 1, 0 }
  0x13   : > { %s89_s30 = sor.u32 %s88_s25, %s87_s29  ;;  %p499_p13 = scmp.lt.s32.totalorder %s732_s19, 4 }
  0x14   : > { %p90_p11 = scmp.eq.s32.totalorder %s89_s30, 0  ;;  %s173_s5 = sand.u32 1, %s712_s14  }
  0x15   : > { %s1002_s4 = scalar_select %p834_p12, 1, 0 }
  0x16   : > { %s841_s6 = scalar_select %p90_p11, %s712_s14, %s92_s24  }
  0x17   : > { %s485_s7 = smul.u32 24, %s173_s5  ;;  %p846_p0 = pnand %p499_p13, %p816_p3 }
  0x18   : > { %s483_s8 = smul.u32 6, %s728_s18  ;;  %s858_s26 = scalar_lea.sflag [#allocation3], %s173_s5 }
  0x19   : > { %s177_s11 = scalar_lea.vmem [#allocation2], %s485_s7  ;;  %p606_p2 = pneg %p846_p0 }
  0x1a   : > { %s183_s10 = sadd.s32 %s724_s17, %s483_s8  ;;  %s186_s20 = sshll.u32 %s177_s11, 4  ;;  %s851_s20 = int_to_ptr.vmem [resolvable:$true] %s186_s20 }
  0x1b   : > { %s469_s21 = sshll.u32 %s183_s10, 7  ;;  %s609_s10 = scalar_lea.hbm %s996_s2, 1536 }
  0x1c   : > { %s856_s24 = scalar_lea.hbm %s996_s2, %s469_s21 }
  0x1d   : > { %s604_s30 = scalar_lea.hbm %s856_s24, 384  ;;  %p610_p5 = scmp.lt.u32.totalorder %s856_s24, %s996_s2 }
  0x1e   : > { %p605_p1 = scmp.ne.s32.totalorder %s856_s24, %s604_s30  ;;  %p611_p6 = scmp.lt.u32.totalorder %s609_s10, %s604_s30 }
  0x1f   : > { %p613_p10 = scmp.lt.u32.totalorder %s604_s30, %s856_s24 }
  0x20   : > { %p607_p3 = pnand %p606_p2, %p605_p1  ;;  %p612_p7 = por %p611_p6, %p610_p5 }
  0x22   : > { %p608_p4 = pneg %p607_p3  ;;  %p614_p11 = por %p613_p10, %p612_p7 }
  0x24   : > { %p615_p13 = pnand %p614_p11, %p608_p4 }
  0x26   : > { %618 = shalt.err (!%p615_p13)
}
  0x27   : > { %s619_s5 = scalar_lea.vmem %s851_s20, 384  ;;  %s734_s25 = smov [#allocation2]  }
  0x28   : > { %p620_p1 = scmp.ne.s32.totalorder %s851_s20, %s619_s5  ;;  %s624_s29 = sshll.u32 %s734_s25, 4  ;;  %s625_s29 = int_to_ptr.vmem [resolvable:$false] %s624_s29 }
  0x29   : > { %s626_s7 = scalar_lea.vmem %s625_s29, 768  ;;  %p627_p9 = scmp.lt.s32.totalorder %s851_s20, %s625_s29 }
  0x2a   : > { %p622_p3 = pnand %p620_p1, %p606_p2  ;;  %p628_p5 = scmp.lt.s32.totalorder %s626_s7, %s619_s5 }
  0x2c   : > { %p623_p12 = pneg %p622_p3  ;;  %p629_p6 = por %p628_p5, %p627_p9 }
  0x2e   : > { %p630_p7 = pnand %p629_p6, %p623_p12 }
  0x30   : > { %633 = shalt.err (!%p630_p7)
}
  0x31   : > { %s735_s30 = smov 256   ;;  %s736_s8 = smov 128  }
  0x32   : > { %s737_s10 = smov 8   ;;  %p470_p2 = scmp.ge.s32.totalorder %s732_s19, 1 }
  0x33   : > { %494 = dma.hbm_to_vmem [thread:$0]  (!%p846_p0), %s856_s24, 384, %s851_s20, %s858_s26, %s735_s30, %s736_s8, %s737_s10  }
  0x34   : > { %p194_p4 = scmp.lt.s32.totalorder %s732_s19, 5 }
  0x36   : > { %p195_p10 = pnand %p470_p2, %p194_p4 }
  0x37   : > { %s889_s11 = sand.u32 (!%p195_p10), 1, %s708_s13  }
  0x38   : > { %198 = sbr.rel (%p195_p10) target bundleno = 222 (0xde), region = 32  ;;  %s201_s5 = scalar_lea.sflag (!%p195_p10), [#allocation3], %s889_s11 }
  0x39   : > { %s486_s21 = smul.u32 (!%p195_p10), 24, %s889_s11 }
  0x3b   : > { %s895_s25 = scalar_lea.vmem (!%p195_p10), [#allocation2], %s486_s21 }
  0x3f   : > { %695 = dma.done.wait (%p824_p8), %s201_s5, 384  }
  0x40   : > { %697 = vsyncadd (%p824_p8), %s201_s5, 4294966912  ;;  %s240_s9 = smul.u32 3, %s720_s16  ;;  %v738_v0 = vmov 0   ;;  %v252_v1 = vld [vmem:[%s895_s25] sm:$0x3]  ;;  %p236_p8 = scmp.lt.s32.totalorder %s716_s15, 1 }
  0x41   : > { %572 = vset.pattern.permute.xlu0 %v738_v0  ;;  %573 = vset.pattern.permute.xlu1 %v738_v0  ;;  %v253_v2 = vld [vmem:[%s895_s25 + $0x8] sm:$0x3]  ;;  %v254_v3 = vld [vmem:[%s895_s25 + $0x10] sm:$0x3]  ;;  %v473_v6 = vmul.f32 -1.442695, %v252_v1 }
  0x42   : > { %p241_p9 = scmp.lt.s32.totalorder %s240_s9, 5  ;;  %v474_v7 = vmul.f32 -1.442695, %v253_v2  ;;  %v475_v9 = vmul.f32 -1.442695, %v254_v3  ;;  %s918_s5 = scalar_lea.vmem [#allocation5], %s486_s21 }
  0x43   : > { %v306_v10 = vld [vmem:[%s895_s25 + $0x4] sm:$0xf]  ;;  %574 = vpow2.f32 %v473_v6  ;;  %v307_v11 = vld [vmem:[%s895_s25 + $0xc] sm:$0xf]  ;;  %v308_v12 = vld [vmem:[%s895_s25 + $0x14] sm:$0xf] }
  0x44   : > { %s1020_s9 = smov (!%p241_p9, %s240_s9), 5  ;;  %v476_v13 = vmul.f32 -1.442695, %v306_v10  ;;  %576 = vpow2.f32 %v474_v7  ;;  %v477_v14 = vmul.f32 -1.442695, %v307_v11  ;;  %s484_s21 = smul.u32 6, %s720_s16 }
  0x45   : > { %s472_s20 = sshll.u32 %s1020_s9, 1  ;;  %578 = vpow2.f32 %v475_v9  ;;  %v478_v15 = vmul.f32 -1.442695, %v308_v12  ;;  %v255_v41 = vld [vmem:[%s895_s25 + $0x2] sm:$0x3]  ;;  %s337_s26 = scalar_lea.sflag [#allocation4], %s889_s11 }
  0x46   : > { %s244_s29 = scalar_lea.vmem %s995_s1, %s472_s20  ;;  %580 = vpow2.f32 %v476_v13  ;;  %v257_v42 = vld [vmem:[%s895_s25 + $0x12] sm:$0x3]  ;;  %v282_v43 = vmul.f32 1.442695, %v255_v41  ;;  %v256_v45 = vld [vmem:[%s895_s25 + $0xa] sm:$0x3]  ;;  %s349_s9 = sadd.s32 %s716_s15, %s484_s21 }
  0x47   : > { %v249_v4 = vld [vmem:[%s244_s29] sm:$0x3]  ;;  %v251_v5 = vld [vmem:[%s244_s29 + $0x4] sm:$0x3]  ;;  %v250_v8 = vld [vmem:[%s244_s29 + $0x2] sm:$0x3]  ;;  %582 = vpow2.f32 %v477_v14 }
  0x48   : > { %290 = vperm.xlu0 %572, %v249_v4   ;;  %300 = vperm.xlu1 %573, %v251_v5   ;;  %584 = vpow2.f32 %v478_v15  ;;  %s237_s27 = scalar_select %p236_p8, %s716_s15, 1  ;;  %v286_v44 = vmul.f32 1.442695, %v257_v42  ;;  %v284_v46 = vmul.f32 1.442695, %v256_v45 }
  0x49   : > { %s352_s20 = sshll.u32 %s918_s5, 4  ;;  %s480_s24 = sshll.u32 %s349_s9, 7  ;;  %s932_s20 = int_to_ptr.vmem [resolvable:$true] %s352_s20 }
  0x4a   : > { %s471_s7 = sshll.u32 %s237_s27, 1  ;;  %s939_s15 = scalar_lea.hbm %s997_s3, %s480_s24 }
  0x4b   : > { %s239_s10 = scalar_lea.vmem %s994_s0, %s471_s7  ;;  %s634_s29 = scalar_lea.vmem %s932_s20, 384 }
  0x4c   : > { %295 = vperm.xlu0 %572, %v250_v8   ;;  %v248_v28 = vld [vmem:[%s239_s10] sm:$0x3]  ;;  %p635_p12 = scmp.ne.s32.totalorder %s932_s20, %s634_s29  ;;  %p1004_p0 = scmp.ne.s32.totalorder %s1001_s28, 0 }
  0x4d   : > { %v575_v16 = vpop.eup %574  ;;  %s739_s27 = smov [#allocation5]  }
  0x4e   : > { %v577_v17 = vpop.eup %576  ;;  %v267_v18 = vadd.f32 1.0, %v575_v16  ;;  %p636_p11 = pnand %p635_p12, %p1004_p0  ;;  %s638_s7 = sshll.u32 %s739_s27, 4  ;;  %s639_s7 = int_to_ptr.vmem [resolvable:$false] %s638_s7 }
  0x4f   : > { %v579_v19 = vpop.eup %578  ;;  %v268_v20 = vadd.f32 1.0, %v577_v17  ;;  %s640_s30 = scalar_lea.vmem %s639_s7, 768  ;;  %p641_p1 = scmp.lt.s32.totalorder %s932_s20, %s639_s7 }
  0x50   : > { %v269_v21 = vadd.f32 1.0, %v579_v19  ;;  %586 = vrcp.f32 %v267_v18  ;;  %v581_v22 = vpop.eup %580  ;;  %p637_p13 = pneg %p636_p11  ;;  %p642_p3 = scmp.lt.s32.totalorder %s640_s30, %s634_s29 }
  0x51   : > { %588 = vrcp.f32 %v268_v20  ;;  %v583_v23 = vpop.eup %582  ;;  %v318_v24 = vadd.f32 1.0, %v581_v22 }
  0x52   : > { %590 = vrcp.f32 %v269_v21  ;;  %v585_v25 = vpop.eup %584  ;;  %v319_v26 = vadd.f32 1.0, %v583_v23  ;;  %p643_p5 = por %p642_p3, %p641_p1 }
  0x53   : > { %v320_v27 = vadd.f32 1.0, %v585_v25  ;;  %592 = vrcp.f32 %v318_v24 }
  0x54   : > { %594 = vrcp.f32 %v319_v26  ;;  %p644_p6 = pnand %p643_p5, %p637_p13 }
  0x55   : > { %596 = vrcp.f32 %v320_v27 }
  0x56   : > { %598 = vpow2.f32 %v282_v43 }
  0x57   : > { %600 = vpow2.f32 %v286_v44 }
  0x58   : > { %602 = vpow2.f32 %v284_v46 }
  0x5a   : > { %v587_v29 = vpop.eup %586 }
  0x5b   : > { %v589_v30 = vpop.eup %588  ;;  %v276_v31 = vadd.f32 %v587_v29, %v248_v28 }
  0x5c   : > { %v591_v32 = vpop.eup %590  ;;  %v277_v33 = vadd.f32 %v589_v30, %v248_v28 }
  0x5d   : > { %v278_v34 = vadd.f32 %v591_v32, %v248_v28  ;;  %v279_v35 = vmul.f32 32.0, %v276_v31  ;;  %v593_v36 = vpop.eup %592 }
  0x5e   : > { %v280_v37 = vmul.f32 32.0, %v277_v33  ;;  %v595_v38 = vpop.eup %594  ;;  %333 = vst [vmem:[%s918_s5 + $0x4] sm:$0xf] %v593_v36 }
  0x5f   : > { %v281_v39 = vmul.f32 32.0, %v278_v34  ;;  %327 = vst [vmem:[%s918_s5] sm:$0x3] %v279_v35  ;;  %v597_v40 = vpop.eup %596  ;;  %334 = vst [vmem:[%s918_s5 + $0xc] sm:$0xf] %v595_v38 }
  0x60   : > { %328 = vst [vmem:[%s918_s5 + $0x8] sm:$0x3] %v280_v37  ;;  %335 = vst [vmem:[%s918_s5 + $0x14] sm:$0xf] %v597_v40  ;;  %v599_v47 = vpop.eup %598 }
  0x61   : > { %329 = vst [vmem:[%s918_s5 + $0x10] sm:$0x3] %v281_v39  ;;  %v601_v48 = vpop.eup %600 }
  0x62   : > { %v603_v53 = vpop.eup %602 }
  0xc7   : > { %v291_v49 = vpop.permute.xlu0 %290  ;;  %v301_v50 = vpop.permute.xlu1 %300 }
  0xc8   : > { %v303_v51 = vmul.f32 %v599_v47, %v291_v49  ;;  %v305_v52 = vmul.f32 %v601_v48, %v301_v50 }
  0xca   : > { %330 = vst [vmem:[%s918_s5 + $0x2] sm:$0x3] %v303_v51  ;;  %332 = vst [vmem:[%s918_s5 + $0x12] sm:$0x3] %v305_v52 }
  0xcb   : > { %v296_v54 = vpop.permute.xlu0 %295 }
  0xcc   : > { %v304_v55 = vmul.f32 %v603_v53, %v296_v54 }
  0xce   : > { %331 = vst [vmem:[%s918_s5 + $0xa] sm:$0x3] %v304_v55 }
  0xcf   : > { %647 = shalt.err (!%p644_p6)
}
  0xd0   : > { %s648_s8 = scalar_lea.hbm %s939_s15, 384  ;;  %s652_s21 = scalar_lea.hbm %s997_s3, 1536 }
  0xd1   : > { %p649_p7 = scmp.ne.s32.totalorder %s939_s15, %s648_s8  ;;  %p653_p10 = scmp.lt.u32.totalorder %s939_s15, %s997_s3 }
  0xd2   : > { %p654_p9 = scmp.lt.u32.totalorder %s652_s21, %s648_s8  ;;  %p656_p12 = scmp.lt.u32.totalorder %s648_s8, %s939_s15 }
  0xd3   : > { %p650_p2 = pnand %p649_p7, %p1004_p0 }
  0xd4   : > { %p655_p8 = por %p654_p9, %p653_p10 }
  0xd5   : > { %p651_p4 = pneg %p650_p2 }
  0xd6   : > { %p657_p11 = por %p656_p12, %p655_p8 }
  0xd8   : > { %p658_p13 = pnand %p657_p11, %p651_p4 }
  0xda   : > { %661 = shalt.err (!%p658_p13)
}
  0xdb   : > { %s740_s16 = smov 128   ;;  %s741_s25 = smov 256  }
  0xdc   : > { %s742_s29 = smov 8  }
  0xdd   : > { %489 = dma.vmem_to_hbm [thread:$0]  (%p1004_p0), %s932_s20, 384, %s939_s15, %s337_s26, %s740_s16, %s741_s25, %s742_s29  }
  0xde PF: > { %p500_p1 = scmp.ge.s32.totalorder %s732_s19, 2  ;;  %s367_s27 = sand.u32 1, %s704_s12  }
  0xdf   : > { %p1005_p3 = scmp.ne.s32.totalorder %s1002_s4, 0  ;;  %s368_s7 = scalar_lea.sflag [#allocation4], %s367_s27 }
  0xe1   : > { %p496_p5 = pnand %p500_p1, %p1005_p3 }
  0xe3   : > { %699 = dma.done.wait (!%p496_p5), %s368_s7, 384  }
  0xe4   : > { %701 = vsyncadd (!%p496_p5), %s368_s7, 4294966912  ;;  %s19_s19 = sadd.s32 1, %s732_s19   ;;  %s1006_s12 = smov %s708_s13 }
  0xe5   : > { %p16_p6 = scmp.ge.s32.totalorder %s19_s19, 6   ;;  %s1007_s13 = smov %s712_s14 }
  0xe6   : > { %s1008_s14 = smov %s841_s6  ;;  %s1009_s15 = smov %s724_s17 }
  0xe7   : > { %s1010_s16 = smov %s728_s18  ;;  %s1011_s17 = smov %s1014_s22 }
  0xe8   : > { %s1012_s18 = smov %s1018_s23  ;;  %18 = sbr.rel (!%p16_p6) target bundleno = 7 (0x7), region = 83 }
  0xef   :  { %373 = vsyncpa [#allocation3], 1 }
  0xf0   :  { %375 = vsyncpa [#allocation3 + $0x1], 1 }
  0xf1   :  { %376 = vsyncpa [#allocation4], 1 }
  0xf2   :  { %378 = vsyncpa [#allocation4 + $0x1], 1 }

</bundles_post_ra>
